<compile_context>
chip_gen: v6e
topology: v6e:2x2x1
jax: 0.10.0
libtpu: 0.0.40
codegen_flags: <defaults>
</compile_context>

<pallas_src>
import numpy as np
import jax
import jax.numpy as jnp
from jax import lax
from jax.experimental import pallas as pl
from jax.experimental.pallas import tpu as pltpu


def _make_reg_kernel(ht, th, wd):
    """Builds the tiled regularization kernel; closes over static sizes."""

    def kernel(x_ref, rsum_ref, rcnt_ref, rmax_ref, prev_ref):
        r = pl.program_id(1)

        @pl.when(r == 0)
        def _init():
            rsum_ref[...] = jnp.zeros_like(rsum_ref)
            rcnt_ref[...] = jnp.zeros_like(rcnt_ref)
            rmax_ref[...] = jnp.full_like(rmax_ref, -jnp.inf)
            prev_ref[...] = jnp.zeros_like(prev_ref)

        x = x_ref[...]                                    # (th, wd) row tile

        # Shifted neighbours via XLU rotations (shift n-1 == shift -1, modular).
        xr = pltpu.roll(x, shift=wd - 1, axis=1)          # x[i, j+1]  (lane shift)
        xd = pltpu.roll(x, shift=th - 1, axis=0)          # x[i+1, j]  (sublane shift)

        lh = x + xr                                       # kernel_h response
        lv = x - xd                                       # kernel_v response
        tmp = jnp.log(lh * lh + lv * lv + 1.0)

        rows = lax.broadcasted_iota(jnp.int32, (th, wd), 0)
        cols = lax.broadcasted_iota(jnp.int32, (th, wd), 1)
        g = rows + r * th                                 # global centre-row index
        valid = ((rows < th - 1) & (g >= 1) & (g <= ht - 2)
                 & (cols >= 1) & (cols <= wd - 2))

        # ---- boundary centre row carried from the previous row tile -----------
        prev = prev_ref[...]                              # (1, wd): last row of tile r-1
        bh = prev + pltpu.roll(prev, shift=wd - 1, axis=1)
        bv = prev - x[0:1, :]
        btmp = jnp.log(bh * bh + bv * bv + 1.0)
        bcols = lax.broadcasted_iota(jnp.int32, (1, wd), 1)
        g0 = r * th - 1
        bvalid = ((r > 0) & (g0 >= 1) & (g0 <= ht - 2)
                  & (bcols >= 1) & (bcols <= wd - 2))

        # stash this tile's last row as the halo for the next grid step
        prev_ref[...] = x[th - 1:th, :]

        pos = valid & (tmp > 0.0)
        bpos = bvalid & (btmp > 0.0)
        psum = (jnp.sum(jnp.where(pos, tmp, 0.0))
                + jnp.sum(jnp.where(bpos, btmp, 0.0)))
        pcnt = (jnp.sum(pos.astype(jnp.float32))
                + jnp.sum(bpos.astype(jnp.float32)))
        pmax = jnp.maximum(jnp.max(jnp.where(valid, tmp, -jnp.inf)),
                           jnp.max(jnp.where(bvalid, btmp, -jnp.inf)))

        rsum_ref[...] = rsum_ref[...] + psum
        rcnt_ref[...] = rcnt_ref[...] + pcnt
        rmax_ref[...] = jnp.maximum(rmax_ref[...], pmax)

    return kernel


def pallas_regularization_loss(y_pred, row_block=256):
    """Equivalent to RegularizationLoss.forward (y_pred: [bs, ch, ht, wd] f32)."""
    bs, ch, ht, wd = y_pred.shape
    assert ht >= 3 and wd >= 3, "valid 3x3 conv needs ht, wd >= 3"
    n_bc = bs * ch
    x3 = y_pred.reshape(n_bc, ht, wd)

    th = ht if ht <= row_block else row_block
    if th != ht:
        assert th % 8 == 0, "row_block must be a multiple of 8"
    n_rb = pl.cdiv(ht, th)

    kernel = _make_reg_kernel(ht, th, wd)
    scal = jax.ShapeDtypeStruct((n_bc, 1, 128), jnp.float32)
    out_spec = pl.BlockSpec((None, 1, 128), lambda b, r: (b, 0, 0))

    rsum, rcnt, rmax = pl.pallas_call(
        kernel,
        out_shape=(scal, scal, scal),
        grid_spec=pltpu.PrefetchScalarGridSpec(
            num_scalar_prefetch=0,
            grid=(n_bc, n_rb),
            in_specs=[pl.BlockSpec((None, th, wd), lambda b, r: (b, r, 0))],
            out_specs=(out_spec, out_spec, out_spec),
            scratch_shapes=[pltpu.VMEM((1, wd), jnp.float32)],
        ),
        compiler_params=pltpu.CompilerParams(
            dimension_semantics=("parallel", "arbitrary"),
            vmem_limit_bytes=32 * 1024 * 1024,
        ),
    )(x3)

    total_sum = jnp.sum(rsum[:, 0, 0])
    total_cnt = jnp.sum(rcnt[:, 0, 0])
    total_max = jnp.max(rmax[:, 0, 0])
    # TODO(synk): `loss[loss > 0].mean()` / `if loss.max() > 0` are dynamic-shape /
    # Python-branch constructs; implemented exactly via masked sum/count + jnp.where.
    return jnp.where(total_max > 0.0,
                     total_sum / jnp.maximum(total_cnt, 1.0),
                     jnp.float32(0.0))


def _reference_loss(y_pred):
    """Pure-JAX mirror of the PyTorch module for a correctness sanity check."""
    c = y_pred[:, :, 1:-1, 1:-1]
    rgt = y_pred[:, :, 1:-1, 2:]
    dwn = y_pred[:, :, 2:, 1:-1]
    tmp = jnp.log((c + rgt) ** 2 + (c - dwn) ** 2 + 1.0)
    pos = tmp > 0.0
    return jnp.where(
        jnp.max(tmp) > 0.0,
        jnp.sum(jnp.where(pos, tmp, 0.0))
        / jnp.maximum(jnp.sum(pos.astype(jnp.float32)), 1.0),
        jnp.float32(0.0))


if __name__ == "__main__":
    bs, ch, ht, wd = 2, 4, 16, 16
    key = jax.random.PRNGKey(0)
    # "instance map after relu": non-negative with flat zero regions, so some conv
    # responses are exactly zero and the loss>0 masking / count path is exercised.
    y_pred = jnp.maximum(
        jax.random.normal(key, (bs, ch, ht, wd), jnp.float32) * 2.0 + 0.5, 0.0)

    # row_block=8 -> two row tiles per image, exercising the halo carry and the
    # @pl.when accumulator across the reduction axis.
    out = pallas_regularization_loss(y_pred, row_block=8)
    out = jax.block_until_ready(out)

    ref = _reference_loss(y_pred)
    assert np.isfinite(float(out))
    np.testing.assert_allclose(float(out), float(ref), rtol=1e-4, atol=1e-5)
    print("KERNEL_OK")
</pallas_src>

<mosaic_0001>
module attributes {stable_mosaic.version = 11 : i64} {
  func.func @kernel(%arg0: i32, %arg1: i32, %arg2: memref<1x8x16xf32, #tpu.memory_space<vmem>>, %arg3: memref<1x1x128xf32, #tpu.memory_space<vmem>>, %arg4: memref<1x1x128xf32, #tpu.memory_space<vmem>>, %arg5: memref<1x1x128xf32, #tpu.memory_space<vmem>>, %arg6: memref<1x16xf32, #tpu.memory_space<vmem>>) attributes {dimension_semantics = [#tpu.dimension_semantics<parallel>, #tpu.dimension_semantics<arbitrary>], iteration_bounds = array<i64: 8, 2>, scalar_prefetch = 0 : i64, scratch_operands = 1 : i64, tpu.core_type = #tpu.core_type<tc>, window_params = [{transform_indices = @transform_0, window_bounds = array<i64: 1, 8, 16>}, {transform_indices = @transform_1, window_bounds = array<i64: 1, 1, 128>}, {transform_indices = @transform_2, window_bounds = array<i64: 1, 1, 128>}, {transform_indices = @transform_3, window_bounds = array<i64: 1, 1, 128>}]} {
    %c0_i32 = arith.constant 0 : i32
    %0 = arith.cmpi eq, %arg1, %c0_i32 : i32
    %1 = arith.extui %0 : i1 to i32
    %c0_i32_0 = arith.constant 0 : i32
    %2 = arith.cmpi ne, %1, %c0_i32_0 : i32
    scf.if %2 {
      %cst_49 = arith.constant 0.000000e+00 : f32
      %128 = vector.broadcast %cst_49 : f32 to vector<1x128xf32>
      %c0_50 = arith.constant 0 : index
      %c0_51 = arith.constant 0 : index
      %c0_52 = arith.constant 0 : index
      %129 = vector.load %arg3[%c0_50, %c0_51, %c0_52] : memref<1x1x128xf32, #tpu.memory_space<vmem>>, vector<1x1x128xf32>
      %130 = vector.shape_cast %129 : vector<1x1x128xf32> to vector<1x128xf32>
      %131 = vector.shape_cast %128 : vector<1x128xf32> to vector<1x1x128xf32>
      tpu.vector_store %arg3[%c0_50, %c0_51, %c0_52], %131 {strides = array<i32>} : memref<1x1x128xf32, #tpu.memory_space<vmem>>, vector<1x1x128xf32>,
      %cst_53 = arith.constant 0.000000e+00 : f32
      %132 = vector.broadcast %cst_53 : f32 to vector<1x128xf32>
      %c0_54 = arith.constant 0 : index
      %c0_55 = arith.constant 0 : index
      %c0_56 = arith.constant 0 : index
      %133 = vector.load %arg4[%c0_54, %c0_55, %c0_56] : memref<1x1x128xf32, #tpu.memory_space<vmem>>, vector<1x1x128xf32>
      %134 = vector.shape_cast %133 : vector<1x1x128xf32> to vector<1x128xf32>
      %135 = vector.shape_cast %132 : vector<1x128xf32> to vector<1x1x128xf32>
      tpu.vector_store %arg4[%c0_54, %c0_55, %c0_56], %135 {strides = array<i32>} : memref<1x1x128xf32, #tpu.memory_space<vmem>>, vector<1x1x128xf32>,
      %cst_57 = arith.constant 0xFF800000 : f32
      %136 = vector.broadcast %cst_57 : f32 to vector<1x128xf32>
      %c0_58 = arith.constant 0 : index
      %c0_59 = arith.constant 0 : index
      %c0_60 = arith.constant 0 : index
      %137 = vector.load %arg5[%c0_58, %c0_59, %c0_60] : memref<1x1x128xf32, #tpu.memory_space<vmem>>, vector<1x1x128xf32>
      %138 = vector.shape_cast %137 : vector<1x1x128xf32> to vector<1x128xf32>
      %139 = vector.shape_cast %136 : vector<1x128xf32> to vector<1x1x128xf32>
      tpu.vector_store %arg5[%c0_58, %c0_59, %c0_60], %139 {strides = array<i32>} : memref<1x1x128xf32, #tpu.memory_space<vmem>>, vector<1x1x128xf32>,
      %cst_61 = arith.constant 0.000000e+00 : f32
      %140 = vector.broadcast %cst_61 : f32 to vector<1x16xf32>
      %c0_62 = arith.constant 0 : index
      %c0_63 = arith.constant 0 : index
      %141 = vector.load %arg6[%c0_62, %c0_63] : memref<1x16xf32, #tpu.memory_space<vmem>>, vector<1x16xf32>
      tpu.vector_store %arg6[%c0_62, %c0_63], %140 {strides = array<i32>} : memref<1x16xf32, #tpu.memory_space<vmem>>, vector<1x16xf32>,
    } else {
    }
    %c0 = arith.constant 0 : index
    %c0_1 = arith.constant 0 : index
    %c0_2 = arith.constant 0 : index
    %3 = vector.load %arg2[%c0, %c0_1, %c0_2] : memref<1x8x16xf32, #tpu.memory_space<vmem>>, vector<1x8x16xf32>
    %4 = vector.shape_cast %3 : vector<1x8x16xf32> to vector<8x16xf32>
    %c15_i32 = arith.constant 15 : i32
    %5 = tpu.dynamic_rotate %4 by %c15_i32 dim 1 : vector<8x16xf32>, i32 -> vector<8x16xf32>
    %c7_i32 = arith.constant 7 : i32
    %6 = tpu.dynamic_rotate %4 by %c7_i32 dim 0 : vector<8x16xf32>, i32 -> vector<8x16xf32>
    %7 = arith.addf %4, %5 : vector<8x16xf32>
    %8 = arith.subf %4, %6 : vector<8x16xf32>
    %9 = arith.mulf %7, %7 : vector<8x16xf32>
    %10 = arith.mulf %8, %8 : vector<8x16xf32>
    %11 = arith.addf %9, %10 : vector<8x16xf32>
    %cst = arith.constant 1.000000e+00 : f32
    %12 = vector.broadcast %cst : f32 to vector<8x16xf32>
    %13 = arith.addf %11, %12 : vector<8x16xf32>
    %14 = math.log %13 : vector<8x16xf32>
    %15 = tpu.iota {dimensions = array<i32: 0>} : vector<8x16xi32>
    %16 = tpu.iota {dimensions = array<i32: 1>} : vector<8x16xi32>
    %c8_i32 = arith.constant 8 : i32
    %17 = arith.muli %arg1, %c8_i32 : i32
    %18 = vector.broadcast %17 : i32 to vector<8x16xi32>
    %19 = arith.addi %15, %18 : vector<8x16xi32>
    %c7_i32_3 = arith.constant 7 : i32
    %20 = vector.broadcast %c7_i32_3 : i32 to vector<8x16xi32>
    %21 = arith.cmpi slt, %15, %20 : vector<8x16xi32>
    %c1_i32 = arith.constant 1 : i32
    %22 = vector.broadcast %c1_i32 : i32 to vector<8x16xi32>
    %23 = arith.cmpi sge, %19, %22 : vector<8x16xi32>
    %24 = arith.andi %21, %23 : vector<8x16xi1>
    %c14_i32 = arith.constant 14 : i32
    %25 = vector.broadcast %c14_i32 : i32 to vector<8x16xi32>
    %26 = arith.cmpi sle, %19, %25 : vector<8x16xi32>
    %27 = arith.andi %24, %26 : vector<8x16xi1>
    %c1_i32_4 = arith.constant 1 : i32
    %28 = vector.broadcast %c1_i32_4 : i32 to vector<8x16xi32>
    %29 = arith.cmpi sge, %16, %28 : vector<8x16xi32>
    %30 = arith.andi %27, %29 : vector<8x16xi1>
    %c14_i32_5 = arith.constant 14 : i32
    %31 = vector.broadcast %c14_i32_5 : i32 to vector<8x16xi32>
    %32 = arith.cmpi sle, %16, %31 : vector<8x16xi32>
    %33 = arith.andi %30, %32 : vector<8x16xi1>
    %c0_6 = arith.constant 0 : index
    %c0_7 = arith.constant 0 : index
    %34 = vector.load %arg6[%c0_6, %c0_7] : memref<1x16xf32, #tpu.memory_space<vmem>>, vector<1x16xf32>
    %c15_i32_8 = arith.constant 15 : i32
    %35 = tpu.dynamic_rotate %34 by %c15_i32_8 dim 1 : vector<1x16xf32>, i32 -> vector<1x16xf32>
    %36 = arith.addf %34, %35 : vector<1x16xf32>
    %37 = vector.extract_strided_slice %4 {offsets = [0, 0], sizes = [1, 16], strides = [1, 1]} : vector<8x16xf32> to vector<1x16xf32>
    %38 = arith.subf %34, %37 : vector<1x16xf32>
    %39 = arith.mulf %36, %36 : vector<1x16xf32>
    %40 = arith.mulf %38, %38 : vector<1x16xf32>
    %41 = arith.addf %39, %40 : vector<1x16xf32>
    %cst_9 = arith.constant 1.000000e+00 : f32
    %42 = vector.broadcast %cst_9 : f32 to vector<1x16xf32>
    %43 = arith.addf %41, %42 : vector<1x16xf32>
    %44 = math.log %43 : vector<1x16xf32>
    %45 = tpu.iota {dimensions = array<i32: 1>} : vector<1x16xi32>
    %c8_i32_10 = arith.constant 8 : i32
    %46 = arith.muli %arg1, %c8_i32_10 : i32
    %c1_i32_11 = arith.constant 1 : i32
    %47 = arith.subi %46, %c1_i32_11 : i32
    %c0_i32_12 = arith.constant 0 : i32
    %48 = arith.cmpi sgt, %arg1, %c0_i32_12 : i32
    %c1_i32_13 = arith.constant 1 : i32
    %49 = arith.cmpi sge, %47, %c1_i32_13 : i32
    %50 = arith.andi %48, %49 : i1
    %c14_i32_14 = arith.constant 14 : i32
    %51 = arith.cmpi sle, %47, %c14_i32_14 : i32
    %52 = arith.andi %50, %51 : i1
    %c1_i32_15 = arith.constant 1 : i32
    %53 = vector.broadcast %c1_i32_15 : i32 to vector<1x16xi32>
    %54 = arith.cmpi sge, %45, %53 : vector<1x16xi32>
    %55 = vector.broadcast %52 : i1 to vector<1x16xi1>
    %56 = arith.andi %55, %54 : vector<1x16xi1>
    %c14_i32_16 = arith.constant 14 : i32
    %57 = vector.broadcast %c14_i32_16 : i32 to vector<1x16xi32>
    %58 = arith.cmpi sle, %45, %57 : vector<1x16xi32>
    %59 = arith.andi %56, %58 : vector<1x16xi1>
    %60 = vector.extract_strided_slice %4 {offsets = [7, 0], sizes = [1, 16], strides = [1, 1]} : vector<8x16xf32> to vector<1x16xf32>
    %c0_17 = arith.constant 0 : index
    %c0_18 = arith.constant 0 : index
    %61 = vector.load %arg6[%c0_17, %c0_18] : memref<1x16xf32, #tpu.memory_space<vmem>>, vector<1x16xf32>
    tpu.vector_store %arg6[%c0_17, %c0_18], %60 {strides = array<i32>} : memref<1x16xf32, #tpu.memory_space<vmem>>, vector<1x16xf32>,
    %cst_19 = arith.constant 0.000000e+00 : f32
    %62 = vector.broadcast %cst_19 : f32 to vector<8x16xf32>
    %63 = arith.cmpf ogt, %14, %62 : vector<8x16xf32>
    %64 = arith.andi %33, %63 : vector<8x16xi1>
    %cst_20 = arith.constant 0.000000e+00 : f32
    %65 = vector.broadcast %cst_20 : f32 to vector<1x16xf32>
    %66 = arith.cmpf ogt, %44, %65 : vector<1x16xf32>
    %67 = arith.andi %59, %66 : vector<1x16xi1>
    %cst_21 = arith.constant 0.000000e+00 : f32
    %68 = vector.broadcast %cst_21 : f32 to vector<8x16xf32>
    %69 = arith.select %64, %14, %68 : vector<8x16xi1>, vector<8x16xf32>
    %70 = vector.shape_cast %69 : vector<8x16xf32> to vector<1x8x16xf32>
    %cst_22 = arith.constant dense<0.000000e+00> : vector<1xf32>
    %71 = vector.multi_reduction <add>, %70, %cst_22 [1, 2] : vector<1x8x16xf32> to vector<1xf32>
    %72 = vector.shape_cast %71 : vector<1xf32> to vector<1x1x1xf32>
    %73 = vector.extract %72[0, 0, 0] : f32 from vector<1x1x1xf32>
    %cst_23 = arith.constant 0.000000e+00 : f32
    %74 = vector.broadcast %cst_23 : f32 to vector<1x16xf32>
    %75 = arith.select %67, %44, %74 : vector<1x16xi1>, vector<1x16xf32>
    %76 = vector.shape_cast %75 : vector<1x16xf32> to vector<1x1x16xf32>
    %cst_24 = arith.constant dense<0.000000e+00> : vector<1xf32>
    %77 = vector.multi_reduction <add>, %76, %cst_24 [1, 2] : vector<1x1x16xf32> to vector<1xf32>
    %78 = vector.shape_cast %77 : vector<1xf32> to vector<1x1x1xf32>
    %79 = vector.extract %78[0, 0, 0] : f32 from vector<1x1x1xf32>
    %80 = arith.addf %73, %79 : f32
    %81 = arith.extui %64 : vector<8x16xi1> to vector<8x16xi32>
    %82 = arith.sitofp %81 : vector<8x16xi32> to vector<8x16xf32>
    %83 = vector.shape_cast %82 : vector<8x16xf32> to vector<1x8x16xf32>
    %cst_25 = arith.constant dense<0.000000e+00> : vector<1xf32>
    %84 = vector.multi_reduction <add>, %83, %cst_25 [1, 2] : vector<1x8x16xf32> to vector<1xf32>
    %85 = vector.shape_cast %84 : vector<1xf32> to vector<1x1x1xf32>
    %86 = vector.extract %85[0, 0, 0] : f32 from vector<1x1x1xf32>
    %87 = arith.extui %67 : vector<1x16xi1> to vector<1x16xi32>
    %88 = arith.sitofp %87 : vector<1x16xi32> to vector<1x16xf32>
    %89 = vector.shape_cast %88 : vector<1x16xf32> to vector<1x1x16xf32>
    %cst_26 = arith.constant dense<0.000000e+00> : vector<1xf32>
    %90 = vector.multi_reduction <add>, %89, %cst_26 [1, 2] : vector<1x1x16xf32> to vector<1xf32>
    %91 = vector.shape_cast %90 : vector<1xf32> to vector<1x1x1xf32>
    %92 = vector.extract %91[0, 0, 0] : f32 from vector<1x1x1xf32>
    %93 = arith.addf %86, %92 : f32
    %cst_27 = arith.constant 0xFF800000 : f32
    %94 = vector.broadcast %cst_27 : f32 to vector<8x16xf32>
    %95 = arith.select %33, %14, %94 : vector<8x16xi1>, vector<8x16xf32>
    %96 = vector.shape_cast %95 : vector<8x16xf32> to vector<1x8x16xf32>
    %cst_28 = arith.constant dense<0xFF800000> : vector<1xf32>
    %97 = vector.multi_reduction <maximumf>, %96, %cst_28 [1, 2] : vector<1x8x16xf32> to vector<1xf32>
    %98 = vector.shape_cast %97 : vector<1xf32> to vector<1x1x1xf32>
    %99 = vector.extract %98[0, 0, 0] : f32 from vector<1x1x1xf32>
    %cst_29 = arith.constant 0xFF800000 : f32
    %100 = vector.broadcast %cst_29 : f32 to vector<1x16xf32>
    %101 = arith.select %59, %44, %100 : vector<1x16xi1>, vector<1x16xf32>
    %102 = vector.shape_cast %101 : vector<1x16xf32> to vector<1x1x16xf32>
    %cst_30 = arith.constant dense<0xFF800000> : vector<1xf32>
    %103 = vector.multi_reduction <maximumf>, %102, %cst_30 [1, 2] : vector<1x1x16xf32> to vector<1xf32>
    %104 = vector.shape_cast %103 : vector<1xf32> to vector<1x1x1xf32>
    %105 = vector.extract %104[0, 0, 0] : f32 from vector<1x1x1xf32>
    %106 = arith.maximumf %99, %105 : f32
    %c0_31 = arith.constant 0 : index
    %c0_32 = arith.constant 0 : index
    %c0_33 = arith.constant 0 : index
    %107 = vector.load %arg3[%c0_31, %c0_32, %c0_33] : memref<1x1x128xf32, #tpu.memory_space<vmem>>, vector<1x1x128xf32>
    %108 = vector.shape_cast %107 : vector<1x1x128xf32> to vector<1x128xf32>
    %109 = vector.broadcast %80 : f32 to vector<1x128xf32>
    %110 = arith.addf %108, %109 : vector<1x128xf32>
    %c0_34 = arith.constant 0 : index
    %c0_35 = arith.constant 0 : index
    %c0_36 = arith.constant 0 : index
    %111 = vector.load %arg3[%c0_34, %c0_35, %c0_36] : memref<1x1x128xf32, #tpu.memory_space<vmem>>, vector<1x1x128xf32>
    %112 = vector.shape_cast %111 : vector<1x1x128xf32> to vector<1x128xf32>
    %113 = vector.shape_cast %110 : vector<1x128xf32> to vector<1x1x128xf32>
    tpu.vector_store %arg3[%c0_34, %c0_35, %c0_36], %113 {strides = array<i32>} : memref<1x1x128xf32, #tpu.memory_space<vmem>>, vector<1x1x128xf32>,
    %c0_37 = arith.constant 0 : index
    %c0_38 = arith.constant 0 : index
    %c0_39 = arith.constant 0 : index
    %114 = vector.load %arg4[%c0_37, %c0_38, %c0_39] : memref<1x1x128xf32, #tpu.memory_space<vmem>>, vector<1x1x128xf32>
    %115 = vector.shape_cast %114 : vector<1x1x128xf32> to vector<1x128xf32>
    %116 = vector.broadcast %93 : f32 to vector<1x128xf32>
    %117 = arith.addf %115, %116 : vector<1x128xf32>
    %c0_40 = arith.constant 0 : index
    %c0_41 = arith.constant 0 : index
    %c0_42 = arith.constant 0 : index
    %118 = vector.load %arg4[%c0_40, %c0_41, %c0_42] : memref<1x1x128xf32, #tpu.memory_space<vmem>>, vector<1x1x128xf32>
    %119 = vector.shape_cast %118 : vector<1x1x128xf32> to vector<1x128xf32>
    %120 = vector.shape_cast %117 : vector<1x128xf32> to vector<1x1x128xf32>
    tpu.vector_store %arg4[%c0_40, %c0_41, %c0_42], %120 {strides = array<i32>} : memref<1x1x128xf32, #tpu.memory_space<vmem>>, vector<1x1x128xf32>,
    %c0_43 = arith.constant 0 : index
    %c0_44 = arith.constant 0 : index
    %c0_45 = arith.constant 0 : index
    %121 = vector.load %arg5[%c0_43, %c0_44, %c0_45] : memref<1x1x128xf32, #tpu.memory_space<vmem>>, vector<1x1x128xf32>
    %122 = vector.shape_cast %121 : vector<1x1x128xf32> to vector<1x128xf32>
    %123 = vector.broadcast %106 : f32 to vector<1x128xf32>
    %124 = arith.maximumf %122, %123 : vector<1x128xf32>
    %c0_46 = arith.constant 0 : index
    %c0_47 = arith.constant 0 : index
    %c0_48 = arith.constant 0 : index
    %125 = vector.load %arg5[%c0_46, %c0_47, %c0_48] : memref<1x1x128xf32, #tpu.memory_space<vmem>>, vector<1x1x128xf32>
    %126 = vector.shape_cast %125 : vector<1x1x128xf32> to vector<1x128xf32>
    %127 = vector.shape_cast %124 : vector<1x128xf32> to vector<1x1x128xf32>
    tpu.vector_store %arg5[%c0_46, %c0_47, %c0_48], %127 {strides = array<i32>} : memref<1x1x128xf32, #tpu.memory_space<vmem>>, vector<1x1x128xf32>,
    return
  }
  func.func @transform_0(%arg0: i32, %arg1: i32) -> (i32, i32, i32) {
    %c0_i32 = arith.constant 0 : i32
    %c0_i32_0 = arith.constant 0 : i32
    return %arg0, %arg1, %c0_i32 : i32, i32, i32
  }
  func.func @transform_1(%arg0: i32, %arg1: i32) -> (i32, i32, i32) {
    %c0_i32 = arith.constant 0 : i32
    %c0_i32_0 = arith.constant 0 : i32
    %c0_i32_1 = arith.constant 0 : i32
    return %arg0, %c0_i32, %c0_i32_0 : i32, i32, i32
  }
  func.func @transform_2(%arg0: i32, %arg1: i32) -> (i32, i32, i32) {
    %c0_i32 = arith.constant 0 : i32
    %c0_i32_0 = arith.constant 0 : i32
    %c0_i32_1 = arith.constant 0 : i32
    return %arg0, %c0_i32, %c0_i32_0 : i32, i32, i32
  }
  func.func @transform_3(%arg0: i32, %arg1: i32) -> (i32, i32, i32) {
    %c0_i32 = arith.constant 0 : i32
    %c0_i32_0 = arith.constant 0 : i32
    %c0_i32_1 = arith.constant 0 : i32
    return %arg0, %c0_i32, %c0_i32_0 : i32, i32, i32
  }
}

</mosaic_0001>

<bundles_post_ra>
// kernel: tpu_custom_call.1
= control target key start
LH: loop header
LB: loop body
LE: loop exit
PB: predicated region body
PF: predicated region fallthrough
CT: control target
= control target key end

     0   :  { %s1302_s0 = inlined_call_operand.hbm [shape: f32[8,16,16], index: 0, kind: input, shape index: {}]   ;;  %s1303_s1 = inlined_call_operand.hbm [shape: f32[8,1,128], index: 1, kind: output, shape index: {0}]   ;;  %s1304_s2 = inlined_call_operand.hbm [shape: f32[8,1,128], index: 2, kind: output, shape index: {1}]   ;;  %s1305_s3 = inlined_call_operand.hbm [shape: f32[8,1,128], index: 3, kind: output, shape index: {2}]  }
   0x1   :  { %1311 = sst [smem:[#allocation18_spill]] %s1302_s0 }
   0x2   :  { %9 = vsyncpa [#allocation4], 0 }
   0x3   :  { %11 = vsyncpa [#allocation4 + $0x1], 0 }
   0x4   :  { %12 = vsyncpa [#allocation5], 0 }
   0x5   :  { %14 = vsyncpa [#allocation5 + $0x1], 0 }
   0x6   :  { %15 = vsyncpa [#allocation8], 0 }
   0x7   :  { %17 = vsyncpa [#allocation8 + $0x1], 0  ;;  %s969_s12 = smov 0   ;;  %s971_s13 = smov 0  }
   0x8   :  { %s973_s14 = smov 0   ;;  %s975_s15 = smov 0  }
   0x9   :  { %s977_s16 = smov 0   ;;  %s979_s17 = smov 0  }
   0xa   :  { %s981_s18 = smov 0   ;;  %s983_s19 = smov 0  }
   0xb   :  { %s985_s20 = smov 0   ;;  %s987_s21 = smov 0  }
   0xc   :  { %s989_s22 = smov 0  }
   0xd LB: > { %1312 = sst [smem:[#allocation13_spill]] %s917_s17  ;;  %s1023_s23 = sadd.s32 4294967295, %s937_s22   ;;  %s937_s22 = sphi %s989_s22, %s23_s22   ;;  %s933_s21 = sphi %s987_s21, %s1337_s21   ;;  %s929_s20 = sphi %s985_s20, %s1344_s20   ;;  %s925_s19 = sphi %s983_s19, %s1335_s19   ;;  %s921_s18 = sphi %s981_s18, %s1343_s18   ;;  %s917_s17 = sphi %s979_s17, %s1334_s17   ;;  %s913_s16 = sphi %s977_s16, %s1342_s16   ;;  %s909_s15 = sphi %s975_s15, %s1341_s15   ;;  %s905_s14 = sphi %s973_s14, %s1340_s14   ;;  %s901_s13 = sphi %s971_s13, %s1339_s13   ;;  %s897_s12 = sphi %s969_s12, %s1338_s12  }
   0xe   : > { %1313 = sst [smem:[#allocation14_spill]] %s933_s21  ;;  %s1308_s24 = sadd.s32 4294967294, %s937_s22  }
   0xf   : > { %s32_s25 = sadd.s32 1, %s929_s20  ;;  %s35_s26 = sadd.s32 1, %s933_s21 }
  0x10   : > { %p33_p0 = scmp.ge.s32.totalorder %s32_s25, 2  ;;  %s44_s27 = sadd.s32 1, %s917_s17 }
  0x11   : > { %p51_p1 = scmp.ne.s32.totalorder %s917_s17, %s913_s16  ;;  %p52_p2 = scmp.eq.s32.totalorder %s937_s22, 0 }
  0x12   : > { %s1346_s25 = smov (%p33_p0, %s32_s25), 0  ;;  %s1348_s26 = smov (!%p33_p0, %s35_s26), %s933_s21 }
  0x13   : > { %1314 = sst [smem:[#allocation15_spill]] %s1346_s25  ;;  %s40_s28 = ssub.s32 %s929_s20, %s1346_s25 }
  0x14   : > { %p1037_p3 = por %p52_p2, %p51_p1  ;;  %p37_p4 = scmp.ge.s32.totalorder %s1348_s26, 8 }
  0x15   : > { %p57_p5 = scmp.ne.s32.totalorder %s913_s16, %s909_s15  ;;  %p58_p6 = scmp.eq.s32.totalorder %s1023_s23, 0 }
  0x16   : > { %s70_s30 = sadd.s32 1, %s905_s14  ;;  %s1350_s26 = smov (%p37_p4, %s1348_s26), 0 }
  0x17   : > { %1316 = sst [smem:[#allocation16_spill]] %s1350_s26  ;;  %p1046_p7 = por %p58_p6, %p57_p5 }
  0x18   : > { %p80_p8 = scmp.ne.s32.totalorder %s905_s14, %s901_s13  ;;  %s39_s5 = ssub.s32 %s933_s21, %s1350_s26 }
  0x19   : > { %p81_p9 = scmp.eq.s32.totalorder %s1023_s23, 15  ;;  %s41_s6 = sor.u32 %s40_s28, %s39_s5 }
  0x1a   : > { %p68_p10 = scmp.eq.s32.totalorder %s39_s5, 0  ;;  %p42_p11 = scmp.eq.s32.totalorder %s41_s6, 0 }
  0x1b   : > { %p1055_p12 = por %p81_p9, %p80_p8  ;;  %p86_p13 = scmp.ne.s32.totalorder %s901_s13, %s897_s12 }
  0x1c   : > { %s1060_s8 = scalar_select %p68_p10, %s905_s14, %s70_s30  }
  0x1d   : > { %s1063_s9 = scalar_select %p42_p11, %s917_s17, %s44_s27  }
  0x1e   : > { %p87_p0 = scmp.eq.s32.totalorder %s1308_s24, 15  ;;  %p633_p1 = scmp.lt.s32.totalorder %s937_s22, 16 }
  0x1f   : > { %1319 = sst [smem:[#allocation17_spill]] %s1063_s9  ;;  %s159_s11 = sand.u32 1, %s917_s17  }
  0x20   : > { %p1070_p2 = por %p87_p0, %p86_p13  ;;  %s583_s15 = sshll.u32 %s159_s11, 3 }
  0x21   : > { %s584_s28 = sshll.u32 %s933_s21, 1  ;;  %s163_s6 = scalar_lea.vmem [#allocation3], %s583_s15 }
  0x22   : > { %s1320_s10 = scalar_select %p1070_p2, 1, 0 }
  0x23   : > { %s168_s5 = sadd.s32 %s929_s20, %s584_s28  ;;  %s172_s26 = sshll.u32 %s163_s6, 4  ;;  %s173_s26 = int_to_ptr.vmem [resolvable:$true] %s172_s26 }
  0x24   : > { %s585_s30 = sshll.u32 %s168_s5, 7  ;;  %s1321_s0 = sld [smem:[#allocation18_spill]] }
  0x25   : > { %p1082_p4 = pnand %p633_p1, %p1037_p3  ;;  %p586_p5 = scmp.ge.s32.totalorder %s937_s22, 1 }
  0x26   : > { %p177_p6 = scmp.lt.s32.totalorder %s937_s22, 17  ;;  %s160_s17 = scalar_lea.sflag [#allocation4], %s159_s11 }
  0x27   : > { %p735_p8 = pneg %p1082_p4  ;;  %s746_s28 = scalar_lea.vmem %s173_s26, 128 }
  0x28   : > { %p747_p9 = scmp.ne.s32.totalorder %s173_s26, %s746_s28  ;;  %s939_s15 = smov [#allocation3]  }
  0x29   : > { %s751_s5 = sshll.u32 %s939_s15, 4  ;;  %s752_s5 = int_to_ptr.vmem [resolvable:$false] %s751_s5 }
  0x2a   : > { %s170_s9 = scalar_lea.hbm %s1321_s0, %s585_s30  ;;  %p749_p10 = pnand %p747_p9, %p735_p8 }
  0x2b   : > { %s753_s25 = scalar_lea.vmem %s752_s5, 256  ;;  %p754_p13 = scmp.lt.s32.totalorder %s173_s26, %s752_s5 }
  0x2c   : > { %p750_p11 = pneg %p749_p10  ;;  %p755_p0 = scmp.lt.s32.totalorder %s753_s25, %s746_s28 }
  0x2e   : > { %p756_p3 = por %p755_p0, %p754_p13 }
  0x30   : > { %p757_p1 = pnand %p756_p3, %p750_p11 }
  0x32   : > { %760 = shalt.err (!%p757_p1)
}
  0x33   : > { %622 = dma.hbm_to_vmem [thread:$0]  (!%p1082_p4), %s170_s9, 128, %s173_s26, %s160_s17  }
  0x34   : > { %p178_p2 = pnand %p586_p5, %p177_p6 }
  0x35   : > { %s183_s29 = sand.u32 (!%p178_p2), 1, %s913_s16  }
  0x36   : > { %181 = sbr.rel (%p178_p2) target bundleno = 723 (0x2d3), region = 24  ;;  %s587_s11 = sshll.u32 (!%p178_p2), %s183_s29, 3 }
  0x37   : > { %s184_s6 = scalar_lea.sflag (!%p178_p2), [#allocation4], %s183_s29  ;;  %s187_s30 = scalar_lea.vmem (!%p178_p2), [#allocation3], %s587_s11 }
  0x3b   : > { %884 = dma.done.wait (%p1046_p7), %s184_s6, 128  }
  0x3c   : > { %886 = vsyncadd (%p1046_p7), %s184_s6, 4294967168  ;;  %s1102_s24 = sand.u32 1, %s901_s13   ;;  %p588_p2 = scmp.ne.s32.totalorder %s921_s18, 0 }
  0x3d   : > { %s1105_s17 = scalar_lea.vmem [#allocation6], %s1102_s24  ;;  %s1108_s26 = scalar_lea.vmem [#allocation7], %s1102_s24 }
  0x3e   : > { %s1111_s9 = scalar_lea.vmem [#allocation9], %s1102_s24  ;;  %220 = sbr.rel (%p588_p2) target bundleno = 70 (0x46), region = 32 }
  0x43   : > { %vm224_vm0 = vcmask 122880   ;;  %v940_v0 = vmov 0.0   ;;  %v941_v1 = vmov -inf  }
  0x44   : > { %221 = vst [vmem:[%s1105_s17] sm:$0x1] %v940_v0  ;;  %222 = vst [vmem:[%s1108_s26] sm:$0x1] %v940_v0 }
  0x45   : > { %223 = vst [vmem:[%s1111_s9] sm:$0x1] %v941_v1  ;;  %225 = vst.msk [vmem:[#allocation2] sm:$0x1] %vm224_vm0, %v940_v0 }
  0x46 PF: > { %v226_v3 = vld [vmem:[%s187_s30] sm:$0xff]  ;;  %vm309_vm1 = vcmask 130055   ;;  %s942_s4 = smov 16   ;;  %vm227_vm2 = vcmask 1047680   ;;  %v247_v8 = vlaneseq  ;;  %v943_v9 = vmov 1966171168  }
  0x47   : > { %v272_v10 = vunpack.c.l.s4 %v943_v9  ;;  %s944_s27 = smov 127   ;;  %s589_s28 = sshll.u32 %s921_s18, 3  ;;  %v234_v20 = vrot.slane %v226_v3, 1  ;;  %v945_v49 = vmov 0.0  }
  0x48   : > { %v248_v11 = vshrl.u32 %v247_v8, 7  ;;  %s590_s15 = sadd.s32 4294967295, %s589_s28  ;;  %p297_p7 = scmp.gt.s32.totalorder %s921_s18, 0  ;;  %v252_v31 = vstv %s589_s28  ;;  %v250_v37 = vand.u32 127, %v247_v8 }
  0x49   : > { %v273_v12 = vunpack.c.0.s8 %v272_v10  ;;  %p298_p4 = scmp.ge.s32.totalorder %s590_s15, 1  ;;  %v240_v21 = vsub.f32 %v226_v3, %v234_v20  ;;  %p301_p8 = scmp.le.s32.totalorder %s590_s15, 14 }
  0x4a   : > { %v253_v36 = vadd.s32 %v252_v31, %v248_v11  ;;  %vm254_vm3 = vcmp.lt.s32.totalorder %v248_v11, 7  ;;  %vm259_vm7 = vcmp.ge.s32.totalorder %v250_v37, 1  ;;  %vm261_vm10 = vcmp.le.s32.totalorder %v250_v37, 14  ;;  %s1151_s30 = sshll.u32 %s925_s19, 4  ;;  %s946_s6 = smov [#allocation6]  }
  0x4b   : > { %v276_v13 = vsub.s32 %v273_v12, %v248_v11  ;;  %p1123_p5 = pnand %p298_p4, %p297_p7  ;;  %v242_v26 = vmul.f32 %v240_v21, %v240_v21  ;;  %s1158_s15 = scalar_lea.hbm %s1303_s1, %s1151_s30 }
  0x4c   : > { %v263_v2 = vld [vmem:[#allocation2] sm:$0x1]  ;;  %vm255_vm4 = vcmp.ge.s32.totalorder %v253_v36, 1  ;;  %vm257_vm6 = vcmp.le.s32.totalorder %v253_v36, 14  ;;  %s765_s0 = sshll.u32 %s946_s6, 4  ;;  %s766_s0 = int_to_ptr.vmem [resolvable:$false] %s765_s0 }
  0x4d   : > { %264 = vrot.lane.b32.xlu0 %v263_v2, %s942_s4  ;;  %310 = vst.msk [vmem:[#allocation2 - $0x7] sm:$0x80] %vm309_vm1, %v226_v3  ;;  %v289_v22 = vsub.f32 %v263_v2, %v226_v3  ;;  %p300_p6 = pneg %p1123_p5  ;;  %vm256_vm5 = vmand %vm254_vm3, %vm255_vm4  ;;  %vm316_vm3 = vcmask 130048   ;;  %vm328_vm4 = vcmask 122880   ;;  %v388_v36 = vld [vmem:[%s1105_s17] sm:$0x1] }
  0x4e   : > { %vm258_vm8 = vmand %vm256_vm5, %vm257_vm6  ;;  %s767_s21 = scalar_lea.vmem %s766_s0, 32 }
  0x4f   : > { %v291_v28 = vmul.f32 %v289_v22, %v289_v22  ;;  %p302_p9 = pnand %p301_p8, %p300_p6  ;;  %vm260_vm11 = vmand %vm258_vm8, %vm259_vm7 }
  0x50   : > { %vm1129_vm13 = vmand %vm260_vm11, %vm261_vm10 }
  0x51   : > { %228 = vrot.lane.b32.xlu0 %v226_v3, %s942_s4  ;;  %s591_s18 = scalar_select %p302_p9, 0, 1 }
  0x53   : > { %v305_v38 = vstv %s591_s18 }
  0x54   : > { %vm306_vm9 = vcmp.eq.s32.totalorder %v305_v38, 1 }
  0x55   : > { %vm307_vm12 = vmand %vm306_vm9, %vm259_vm7 }
  0x56   : > { %vm1133_vm14 = vmand %vm307_vm12, %vm261_vm10 }
  0xbf   : > { %v265_v4 = vpop.permute.xlu0 %264 }
  0xc0   : > { %v266_v5 = vsel %vm227_vm2, %v265_v4, %v263_v2 }
  0xc1   : > { %267 = vrot.lane.b32.xlu1 %v266_v5, %s942_s4 }
  0xc3   : > { %v229_v6 = vpop.permute.xlu0 %228 }
  0xc4   : > { %v230_v7 = vsel %vm227_vm2, %v229_v6, %v226_v3 }
  0xc5   : > { %231 = vrot.lane.b32.xlu1 %v230_v7, %s942_s4  ;;  %s421_s4 = sshll.u32 %s1105_s17, 4  ;;  %s1163_s4 = int_to_ptr.vmem [resolvable:$true] %s421_s4 }
  0xc6   : > { %s761_s28 = scalar_lea.vmem %s1163_s4, 16  ;;  %p768_p0 = scmp.lt.s32.totalorder %s1163_s4, %s766_s0 }
  0xc7   : > { %p762_p10 = scmp.ne.s32.totalorder %s1163_s4, %s761_s28  ;;  %p769_p3 = scmp.lt.s32.totalorder %s767_s21, %s761_s28 }
  0xc9   : > { %p763_p11 = pnand %p762_p10, %p1055_p12  ;;  %p770_p1 = por %p769_p3, %p768_p0 }
  0xcb   : > { %p764_p13 = pneg %p763_p11 }
  0xcd   : > { %p771_p2 = pnand %p770_p1, %p764_p13 }
 0x133   : > { %v268_v14 = vpop.permute.xlu1 %267 }
 0x134   : > { %v269_v15 = vsel %vm227_vm2, %v268_v14, %v263_v2 }
 0x135   : > { %v277_v16 = vrot.slane %v269_v15, %v276_v13 }
 0x137   : > { %v232_v17 = vpop.permute.xlu1 %231  ;;  %v284_v18 = vrot.slane %v277_v16, %v276_v13 }
 0x138   : > { %v233_v19 = vsel %vm227_vm2, %v232_v17, %v226_v3 }
 0x139   : > { %285 = vrot.lane.b32.xlu1 %v284_v18, %s944_s27  ;;  %236 = vrot.lane.b32.xlu0 %v233_v19, %s944_s27 }
 0x1ab   : > { %v237_v23 = vpop.permute.xlu0 %236  ;;  %v286_v24 = vpop.permute.xlu1 %285 }
 0x1ac   : > { %v239_v25 = vadd.f32 %v237_v23, %v226_v3  ;;  %v288_v27 = vadd.f32 %v286_v24, %v263_v2 }
 0x1ae   : > { %v241_v29 = vmul.f32 %v239_v25, %v239_v25  ;;  %v290_v30 = vmul.f32 %v288_v27, %v288_v27 }
 0x1b0   : > { %v243_v32 = vadd.f32 %v242_v26, %v241_v29  ;;  %v292_v33 = vadd.f32 %v291_v28, %v290_v30 }
 0x1b2   : > { %v244_v34 = vadd.f32 1.0, %v243_v32  ;;  %v293_v35 = vadd.f32 1.0, %v292_v33 }
 0x1b4   : > { %729 = vlog2.f32 %v244_v34 }
 0x1b5   : > { %731 = vlog2.f32 %v293_v35 }
 0x1c1   : > { %v730_v39 = vpop.eup %729 }
 0x1c2   : > { %v732_v40 = vpop.eup %731  ;;  %v246_v41 = vmul.f32 0.6931472, %v730_v39  ;;  %v392_v39 = vld [vmem:[%s1108_s26] sm:$0x1] }
 0x1c3   : > { %v295_v43 = vmul.f32 0.6931472, %v732_v40 }
 0x1c4   : > { %vm311_vm15 = vcmp.gt.f32.partialorder %v246_v41, 0.0  ;;  %v365_v51 = vsel %vm1129_vm13, %v246_v41, -inf }
 0x1c5   : > { %vm313_vm0 = vcmp.gt.f32.partialorder %v295_v43, 0.0  ;;  %vm312_vm1 = vmand %vm1129_vm13, %vm311_vm15  ;;  %v366_v53 = vsel %vm316_vm3, %v365_v51, -inf  ;;  %v376_v56 = vsel %vm1133_vm14, %v295_v43, -inf }
 0x1c6   : > { %vm314_vm2 = vmand %vm1133_vm14, %vm313_vm0  ;;  %v315_v45 = vsel %vm312_vm1, %v246_v41, 0.0  ;;  %v592_v50 = vsel %vm312_vm1, 1.0, %v945_v49  ;;  %v377_v57 = vsel %vm328_vm4, %v376_v56, -inf }
 0x1c7   : > { %v327_v46 = vsel %vm314_vm2, %v295_v43, 0.0  ;;  %v317_v47 = vsel %vm316_vm3, %v315_v45, 0.0  ;;  %v342_v52 = vsel %vm316_vm3, %v592_v50, 0.0  ;;  %v593_v54 = vsel %vm314_vm2, 1.0, %v945_v49 }
 0x1c8   : > { %v329_v48 = vsel %vm328_vm4, %v327_v46, 0.0  ;;  %318 = vadd.xlane.f32.xlu0 %v317_v47  ;;  %v354_v55 = vsel %vm328_vm4, %v593_v54, 0.0 }
 0x1c9   : > { %330 = vadd.xlane.f32.xlu1 %v329_v48 }
 0x1cc   : > { %343 = vadd.xlane.f32.xlu0 %v342_v52 }
 0x1cd   : > { %367 = vmax.xlane.f32.xlu1 %v366_v53 }
 0x1d0   : > { %355 = vadd.xlane.f32.xlu0 %v354_v55 }
 0x1d4   : > { %378 = vmax.xlane.f32.xlu0 %v377_v57 }
 0x251   : > { %v319_v58 = vpop.xlane.xlu0 %318 }
 0x252   : > { %v331_v59 = vpop.xlane.xlu1 %330  ;;  %v320_v60 = vrot.slane %v319_v58, 4 }
 0x253   : > { %v332_v61 = vrot.slane %v331_v59, 4 }
 0x254   : > { %v321_v62 = vadd.f32 %v320_v60, %v319_v58 }
 0x255   : > { %v333_v63 = vadd.f32 %v332_v61, %v331_v59  ;;  %v344_v0 = vpop.xlane.xlu0 %343 }
 0x256   : > { %v322_v1 = vrot.slane %v321_v62, 2  ;;  %v368_v2 = vpop.xlane.xlu1 %367  ;;  %v345_v3 = vrot.slane %v344_v0, 4 }
 0x257   : > { %v334_v4 = vrot.slane %v333_v63, 2  ;;  %v369_v5 = vrot.slane %v368_v2, 4 }
 0x258   : > { %v346_v6 = vadd.f32 %v345_v3, %v344_v0  ;;  %v323_v7 = vadd.f32 %v322_v1, %v321_v62 }
 0x259   : > { %v370_v8 = vmax.f32 %v368_v2, %v369_v5  ;;  %v356_v9 = vpop.xlane.xlu0 %355  ;;  %v335_v10 = vadd.f32 %v334_v4, %v333_v63 }
 0x25a   : > { %v347_v11 = vrot.slane %v346_v6, 2  ;;  %v357_v12 = vrot.slane %v356_v9, 4  ;;  %v324_v13 = vrot.slane %v323_v7, 1 }
 0x25b   : > { %v371_v14 = vrot.slane %v370_v8, 2  ;;  %v336_v15 = vrot.slane %v335_v10, 1 }
 0x25c   : > { %v358_v16 = vadd.f32 %v357_v12, %v356_v9  ;;  %v325_v17 = vadd.f32 %v324_v13, %v323_v7  ;;  %v348_v18 = vadd.f32 %v347_v11, %v346_v6 }
 0x25d   : > { %v372_v19 = vmax.f32 %v370_v8, %v371_v14  ;;  %v379_v20 = vpop.xlane.xlu0 %378  ;;  %v337_v21 = vadd.f32 %v336_v15, %v335_v10 }
 0x25e   : > { %v359_v22 = vrot.slane %v358_v16, 2  ;;  %v380_v23 = vrot.slane %v379_v20, 4  ;;  %599 = vpush %v325_v17  ;;  %v349_v24 = vrot.slane %v348_v18, 1 }
 0x25f   : > { %601 = vpush %v337_v21  ;;  %v373_v28 = vrot.slane %v372_v19, 1 }
 0x260   : > { %v381_v25 = vmax.f32 %v379_v20, %v380_v23  ;;  %v350_v26 = vadd.f32 %v349_v24, %v348_v18  ;;  %v360_v27 = vadd.f32 %v359_v22, %v358_v16 }
 0x261   : > { %v374_v33 = vmax.f32 %v372_v19, %v373_v28 }
 0x262   : > { %v382_v29 = vrot.slane %v381_v25, 2  ;;  %603 = vpush %v350_v26  ;;  %v361_v30 = vrot.slane %v360_v27, 1 }
 0x264   : > { %v383_v31 = vmax.f32 %v381_v25, %v382_v29  ;;  %v362_v32 = vadd.f32 %v361_v30, %v360_v27 }
 0x266   : > { %605 = vpush %v362_v32  ;;  %v384_v34 = vrot.slane %v383_v31, 1 }
 0x267   : > { %607 = vpush %v374_v33 }
 0x268   : > { %v385_v35 = vmax.f32 %v383_v31, %v384_v34 }
 0x26a   : > { %609 = vpush %v385_v35 }
 0x28f   : > { %s600_s25 = spop %599 }
 0x290   : > { %s602_s29 = spop %601 }
 0x291   : > { %s339_s11 = sadd.f32 %s602_s29, %s600_s25  ;;  %s1171_s29 = scalar_lea.hbm %s1304_s2, %s1151_s30 }
 0x293   : > { %v389_v37 = vstv %s339_s11  ;;  %s1161_s5 = spop %603 }
 0x294   : > { %v390_v38 = vadd.f32 %v389_v37, %v388_v36 }
 0x296   : > { %391 = vst [vmem:[%s1105_s17] sm:$0x1] %v390_v38  ;;  %s401_s17 = scalar_lea.sflag [#allocation5], %s1102_s24 }
 0x297   : > { %s1165_s19 = spop %605 }
 0x298   : > { %774 = shalt.err (!%p771_p2)
}
 0x299   : > { %s775_s18 = scalar_lea.hbm %s1158_s15, 16  ;;  %s779_s6 = scalar_lea.hbm %s1303_s1, 128 }
 0x29a   : > { %p776_p7 = scmp.ne.s32.totalorder %s1158_s15, %s775_s18  ;;  %p780_p6 = scmp.lt.s32.totalorder %s1158_s15, %s1303_s1 }
 0x29b   : > { %p781_p8 = scmp.lt.s32.totalorder %s779_s6, %s775_s18 }
 0x29c   : > { %p777_p4 = pnand %p776_p7, %p1055_p12 }
 0x29d   : > { %p782_p9 = por %p781_p8, %p780_p6 }
 0x29e   : > { %p778_p5 = pneg %p777_p4 }
 0x2a0   : > { %p783_p10 = pnand %p782_p9, %p778_p5 }
 0x2a2   : > { %786 = shalt.err (!%p783_p10)
}
 0x2a3   : > { %613 = dma.vmem_to_hbm [thread:$0]  (%p1055_p12), %s1163_s4, 16, %s1158_s15, %s401_s17   ;;  %v396_v42 = vld [vmem:[%s1111_s9] sm:$0x1] }
 0x2a4   : > { %s1328_s0 = sadd.f32 %s1165_s19, %s1161_s5  ;;  %s608_s21 = spop %607 }
 0x2a5   : > { %s447_s11 = sshll.u32 %s1111_s9, 4  ;;  %s610_s27 = spop %609  ;;  %s1214_s11 = int_to_ptr.vmem [resolvable:$true] %s447_s11 }
 0x2a6   : > { %v393_v40 = vstv %s1328_s0  ;;  %s1329_s28 = sshll.u32 %s1108_s26, 4  ;;  %s387_s18 = smax.f32 %s610_s27, %s608_s21  ;;  %s1205_s28 = int_to_ptr.vmem [resolvable:$true] %s1329_s28 }
 0x2a7   : > { %v394_v41 = vadd.f32 %v393_v40, %v392_v39  ;;  %v397_v43 = vstv %s387_s18  ;;  %s1212_s4 = scalar_lea.hbm %s1305_s3, %s1151_s30  ;;  %s1330_s15 = sand.u32 1, %s1023_s23  }
 0x2a8   : > { %v398_v44 = vmax.f32 %v396_v42, %v397_v43  ;;  %s1218_s5 = scalar_lea.sflag [#allocation8], %s1330_s15  ;;  %s787_s19 = scalar_lea.vmem %s1205_s28, 16 }
 0x2a9   : > { %395 = vst [vmem:[%s1108_s26] sm:$0x1] %v394_v41  ;;  %p788_p11 = scmp.ne.s32.totalorder %s1205_s28, %s787_s19  ;;  %s947_s17 = smov [#allocation7]  }
 0x2aa   : > { %s791_s6 = sshll.u32 %s947_s17, 4  ;;  %s792_s6 = int_to_ptr.vmem [resolvable:$false] %s791_s6 }
 0x2ab   : > { %p789_p13 = pnand %p788_p11, %p1055_p12  ;;  %s793_s26 = scalar_lea.vmem %s792_s6, 32 }
 0x2ac   : > { %p794_p3 = scmp.lt.s32.totalorder %s1205_s28, %s792_s6  ;;  %p795_p1 = scmp.lt.s32.totalorder %s793_s26, %s787_s19 }
 0x2ad   : > { %p790_p0 = pneg %p789_p13 }
 0x2ae   : > { %p796_p2 = por %p795_p1, %p794_p3 }
 0x2b0   : > { %p797_p7 = pnand %p796_p2, %p790_p0 }
 0x2b2   : > { %800 = shalt.err (!%p797_p7)
}
 0x2b3   : > { %s801_s23 = scalar_lea.hbm %s1171_s29, 16  ;;  %s805_s21 = scalar_lea.hbm %s1304_s2, 128 }
 0x2b4   : > { %p802_p4 = scmp.ne.s32.totalorder %s1171_s29, %s801_s23  ;;  %p806_p8 = scmp.lt.s32.totalorder %s1171_s29, %s1304_s2 }
 0x2b5   : > { %p807_p9 = scmp.lt.s32.totalorder %s805_s21, %s801_s23 }
 0x2b6   : > { %p803_p5 = pnand %p802_p4, %p1055_p12 }
 0x2b7   : > { %p808_p10 = por %p807_p9, %p806_p8 }
 0x2b8   : > { %p804_p6 = pneg %p803_p5 }
 0x2ba   : > { %p809_p11 = pnand %p808_p10, %p804_p6 }
 0x2bc   : > { %812 = shalt.err (!%p809_p11)
}
 0x2bd   : > { %614 = dma.vmem_to_hbm [thread:$0]  (%p1055_p12), %s1205_s28, 16, %s1171_s29, %s1218_s5   ;;  %399 = vst [vmem:[%s1111_s9] sm:$0x1] %v398_v44 }
 0x2be   : > { %s813_s24 = scalar_lea.vmem %s1214_s11, 16  ;;  %s948_s25 = smov [#allocation9]  }
 0x2bf   : > { %p814_p13 = scmp.ne.s32.totalorder %s1214_s11, %s813_s24  ;;  %s817_s15 = sshll.u32 %s948_s25, 4  ;;  %s818_s15 = int_to_ptr.vmem [resolvable:$false] %s817_s15 }
 0x2c0   : > { %s819_s19 = scalar_lea.vmem %s818_s15, 32  ;;  %p820_p1 = scmp.lt.s32.totalorder %s1214_s11, %s818_s15 }
 0x2c1   : > { %p815_p0 = pnand %p814_p13, %p1055_p12  ;;  %p821_p2 = scmp.lt.s32.totalorder %s819_s19, %s813_s24 }
 0x2c3   : > { %p816_p3 = pneg %p815_p0  ;;  %p822_p7 = por %p821_p2, %p820_p1 }
 0x2c5   : > { %p823_p4 = pnand %p822_p7, %p816_p3 }
 0x2c7   : > { %826 = shalt.err (!%p823_p4)
}
 0x2c8   : > { %s827_s29 = scalar_lea.hbm %s1212_s4, 16  ;;  %s831_s17 = scalar_lea.hbm %s1305_s3, 128 }
 0x2c9   : > { %p828_p5 = scmp.ne.s32.totalorder %s1212_s4, %s827_s29  ;;  %p832_p9 = scmp.lt.s32.totalorder %s1212_s4, %s1305_s3 }
 0x2ca   : > { %p833_p10 = scmp.lt.s32.totalorder %s831_s17, %s827_s29 }
 0x2cb   : > { %p829_p6 = pnand %p828_p5, %p1055_p12 }
 0x2cc   : > { %p834_p11 = por %p833_p10, %p832_p9 }
 0x2cd   : > { %p830_p8 = pneg %p829_p6 }
 0x2cf   : > { %p835_p13 = pnand %p834_p11, %p830_p8 }
 0x2d1   : > { %838 = shalt.err (!%p835_p13)
}
 0x2d2   : > { %615 = dma.vmem_to_hbm [thread:$0]  (%p1055_p12), %s1214_s11, 16, %s1212_s4, %s1218_s5  }
 0x2d3 PF: > { %p634_p0 = scmp.ge.s32.totalorder %s937_s22, 2  ;;  %s459_s23 = sand.u32 1, %s897_s12  }
 0x2d4   : > { %p1331_p3 = scmp.ne.s32.totalorder %s1320_s10, 0  ;;  %s460_s30 = scalar_lea.sflag [#allocation5], %s459_s23 }
 0x2d6   : > { %p624_p1 = pnand %p634_p0, %p1331_p3 }
 0x2d8   : > { %p625_p2 = pneg %p624_p1 }
 0x2da   : > { %888 = dma.done.wait (%p625_p2), %s460_s30, 16  }
 0x2db   : > { %890 = vsyncadd (%p625_p2), %s460_s30, 4294967280  ;;  %s1332_s0 = sadd.s32 4294967294, %s937_s22  }
 0x2dc   : > { %s467_s21 = sand.u32 1, %s1332_s0  }
 0x2dd   : > { %s468_s7 = scalar_lea.sflag [#allocation8], %s467_s21 }
 0x2de   : > { %892 = dma.done.wait (%p625_p2), %s468_s7, 32  }
 0x2df   : > { %894 = vsyncadd (%p625_p2), %s468_s7, 4294967264  ;;  %s23_s22 = sadd.s32 1, %s937_s22   ;;  %s1333_s11 = sld [smem:[#allocation13_spill]] }
 0x2e0   : > { %p20_p12 = scmp.ge.s32.totalorder %s23_s22, 18   ;;  %s1334_s17 = sld [smem:[#allocation17_spill]] }
 0x2e1   : > { %s1335_s19 = sld [smem:[#allocation14_spill]]  ;;  %s1338_s12 = smov %s901_s13 }
 0x2e2   : > { %s1336_s10 = sld [smem:[#allocation15_spill]]  ;;  %s1339_s13 = smov %s905_s14 }
 0x2e3   : > { %s1337_s21 = sld [smem:[#allocation16_spill]]  ;;  %s1340_s14 = smov %s1060_s8 }
 0x2e4   : > { %s1341_s15 = smov %s913_s16  ;;  %s1343_s18 = smov %s929_s20 }
 0x2e5   : > { %s1342_s16 = smov %s1333_s11  ;;  %22 = sbr.rel (!%p20_p12) target bundleno = 13 (0xd), region = 105 }
 0x2e8   : > { %s1344_s20 = smov %s1336_s10 }
 0x2ea   :  { %480 = vsyncpa [#allocation4], 1 }
 0x2eb   :  { %482 = vsyncpa [#allocation4 + $0x1], 1 }
 0x2ec   :  { %483 = vsyncpa [#allocation5], 1 }
 0x2ed   :  { %485 = vsyncpa [#allocation5 + $0x1], 1 }
 0x2ee   :  { %486 = vsyncpa [#allocation8], 1 }
 0x2ef   :  { %488 = vsyncpa [#allocation8 + $0x1], 1 }

</bundles_post_ra>
